<compile_context>
chip_gen: v6e
topology: v6e:2x2x1
jax: 0.10.0
libtpu: 0.0.40
codegen_flags: <defaults>
</compile_context>

<pallas_src>
import jax
import jax.numpy as jnp
import numpy as np
from jax.experimental import pallas as pl
from jax.experimental.pallas import tpu as pltpu

# ----- small config (consistent with ModelArgs structure, scaled down) -----
B, S = 2, 8
BS = B * S
INPUT_DIM = 10
IN_PAD = 16                    # INPUT_DIM zero-padded to a sublane multiple
DIM = 32
INTER_DIM = 64
N_HEADS = 1
Q_LORA = 16
KV_LORA = 16
A_DIM = Q_LORA + KV_LORA       # fused [wq_a | wkv_a] output width
QK_HEAD = 16                   # qk_nope_head_dim
V_HEAD = 32
SCALE = QK_HEAD ** (-0.5)
VEC_W = 128                    # lane width of the packed vector-param slab

# rows of the packed vector slab (each row = one per-feature vector at lane 0)
(R_EMBED_B, R_A_B, R_AN_ALPHA, R_AN_W, R_AN_B,
 R_Q_B, R_K_B, R_V_B, R_WO_B,
 R_ATTN_ALPHA, R_ATTN_W, R_ATTN_B,
 R_FFN_ALPHA, R_FFN_W, R_FFN_B,
 R_W13_B, R_W2_B) = range(17)
N_VEC_ROWS = 17


# ------------------------------- kernel ----------------------------------
def transformer_kernel(x_ref, mask_ref,
                       w_embed_ref, w_a_ref, w_q_ref, w_k_ref, w_v_ref,
                       w_o_ref, w_13_ref, w_2_ref, vecs_ref,
                       out_ref):
    def vrow(r, n):
        # one packed per-feature vector, lane offset 0 -> (1, n); broadcasts
        return vecs_ref[r:r + 1, :n]

    def mm(a, w_ref):
        return jnp.dot(a, w_ref[...], preferred_element_type=jnp.float32)

    x = x_ref[...]                      # (BS, IN_PAD), zero-padded features
    mask = mask_ref[...]                # (BS, BS) block-diagonal causal mask

    # Transformer.embed (+ dropout == identity in eval)
    h = mm(x, w_embed_ref) + vrow(R_EMBED_B, DIM)

    # ---------------- Block: attention sublayer ----------------
    # attn_norm (DyT): w * tanh(alpha * x) + b
    xn = (jnp.tanh(vrow(R_ATTN_ALPHA, DIM) * h) * vrow(R_ATTN_W, DIM)
          + vrow(R_ATTN_B, DIM))

    # fused low-rank projection [wq_a | wkv_a] + fused DyT [q_norm | kv_norm]
    a = mm(xn, w_a_ref) + vrow(R_A_B, A_DIM)
    a = (jnp.tanh(vrow(R_AN_ALPHA, A_DIM) * a) * vrow(R_AN_W, A_DIM)
         + vrow(R_AN_B, A_DIM))

    # q / k / v projections; weights zero-padded over the fused LoRA axis so
    # every output starts at lane offset 0 (no lane slicing of a kv tensor).
    q = mm(a, w_q_ref) + vrow(R_Q_B, QK_HEAD)          # (BS, QK_HEAD)
    k = mm(a, w_k_ref) + vrow(R_K_B, QK_HEAD)          # (BS, QK_HEAD)
    v = mm(a, w_v_ref) + vrow(R_V_B, V_HEAD)           # (BS, V_HEAD)

    # single block-diagonal attention over all B*S rows (one softmax, one P@V)
    s = jax.lax.dot_general(q, k, (((1,), (1,)), ((), ())),
                            preferred_element_type=jnp.float32) * SCALE + mask
    m = jnp.max(s, axis=-1, keepdims=True)
    e = jnp.exp(s - m)
    p = e * pl.reciprocal(jnp.sum(e, axis=-1, keepdims=True), approx=True)
    attn = mm(jnp.dot(p, v, preferred_element_type=jnp.float32), w_o_ref) \
        + vrow(R_WO_B, DIM)

    h = h + attn                        # residual off the pre-norm h (spec)

    # ---------------- Block: FFN sublayer ----------------
    # Spec reassigns x = ffn_norm(x); the FFN residual uses the POST-norm tensor.
    h = (jnp.tanh(vrow(R_FFN_ALPHA, DIM) * h) * vrow(R_FFN_W, DIM)
         + vrow(R_FFN_B, DIM))

    x13 = mm(h, w_13_ref) + vrow(R_W13_B, 2 * INTER_DIM)   # [w1(h)|w3(h)], 128 lanes
    x1 = x13[:, :INTER_DIM]
    x3 = x13[:, INTER_DIM:]
    ffn = mm(x1 * jax.nn.sigmoid(x1) * x3, w_2_ref) + vrow(R_W2_B, DIM)

    out_ref[...] = h + ffn


# ------------------------------ wrapper -----------------------------------
def transformer_forward(tokens2d, mask_full, weights, vecs):
    vspec = pl.BlockSpec(memory_space=pltpu.MemorySpace.VMEM)
    inputs = [tokens2d, mask_full, *weights, vecs]
    out2d = pl.pallas_call(
        transformer_kernel,
        out_shape=jax.ShapeDtypeStruct((BS, DIM), jnp.float32),
        in_specs=[vspec] * len(inputs),
        out_specs=vspec,
    )(*inputs)
    # wrapper-side layout plumbing (free): 2-D slab -> (B, S, DIM)
    return out2d.reshape(B, S, DIM)


# ------------------------- pure-JAX reference ------------------------------
def transformer_ref(tokens, mask, p):
    def dyt(x, a, w, b):
        return jnp.tanh(a * x) * w + b

    x = tokens.reshape(BS, INPUT_DIM)
    h = x @ p['embed_w'] + p['embed_b']
    # Block: attention
    xn = dyt(h, p['attn_alpha'], p['attn_w'], p['attn_b'])
    q = dyt(xn @ p['wq_a_w'] + p['wq_a_b'],
            p['qn_alpha'], p['qn_w'], p['qn_b']) @ p['wq_b_w'] + p['wq_b_b']
    kv = dyt(xn @ p['wkv_a_w'] + p['wkv_a_b'],
             p['kvn_alpha'], p['kvn_w'], p['kvn_b']) @ p['wkv_b_w'] + p['wkv_b_b']
    qr = q.reshape(B, S, N_HEADS, QK_HEAD)
    kvr = kv.reshape(B, S, N_HEADS, QK_HEAD + V_HEAD)
    k, v = kvr[..., :QK_HEAD], kvr[..., QK_HEAD:]
    scores = jnp.einsum("bshd,bthd->bsht", qr, k) * SCALE
    scores = scores + mask[None, :, None, :]
    scores = jax.nn.softmax(scores.astype(jnp.float32), axis=-1)
    o = jnp.einsum("bsht,bthd->bshd", scores, v).reshape(BS, N_HEADS * V_HEAD)
    h = h + (o @ p['wo_w'] + p['wo_b'])
    # Block: FFN (residual from the post-norm tensor, as in the spec)
    h = dyt(h, p['ffn_alpha'], p['ffn_w'], p['ffn_b'])
    x1 = h @ p['w1_w'] + p['w1_b']
    x3 = h @ p['w3_w'] + p['w3_b']
    h = h + (jax.nn.silu(x1) * x3) @ p['w2_w'] + p['w2_b']
    return h.reshape(B, S, DIM)


# --------------------------- param construction ----------------------------
def make_raw_params(key):
    ks = iter(jax.random.split(key, 26))

    def xavier(fin, fout):
        lim = (6.0 / (fin + fout)) ** 0.5
        return jax.random.uniform(next(ks), (fin, fout), jnp.float32, -lim, lim)

    def vec(n, scale=0.1):
        return scale * jax.random.normal(next(ks), (n,), jnp.float32)

    # NOTE: PyTorch init uses zero linear biases, unit DyT weights, alpha=0.5.
    # Random small values / distinct alphas are used here to exercise the
    # host-side packing & fusion paths; forward semantics are unchanged.
    p = {}
    p['embed_w'] = xavier(INPUT_DIM, DIM);          p['embed_b'] = vec(DIM)
    p['wq_a_w'] = xavier(DIM, Q_LORA);              p['wq_a_b'] = vec(Q_LORA)
    p['qn_alpha'] = jnp.float32(0.5)
    p['qn_w'] = 1.0 + vec(Q_LORA);                  p['qn_b'] = vec(Q_LORA)
    p['wq_b_w'] = xavier(Q_LORA, N_HEADS * QK_HEAD)
    p['wq_b_b'] = vec(N_HEADS * QK_HEAD)
    p['wkv_a_w'] = xavier(DIM, KV_LORA);            p['wkv_a_b'] = vec(KV_LORA)
    p['kvn_alpha'] = jnp.float32(0.6)
    p['kvn_w'] = 1.0 + vec(KV_LORA);                p['kvn_b'] = vec(KV_LORA)
    p['wkv_b_w'] = xavier(KV_LORA, N_HEADS * (QK_HEAD + V_HEAD))
    p['wkv_b_b'] = vec(N_HEADS * (QK_HEAD + V_HEAD))
    p['wo_w'] = xavier(N_HEADS * V_HEAD, DIM);      p['wo_b'] = vec(DIM)
    p['attn_alpha'] = jnp.float32(0.5)
    p['attn_w'] = 1.0 + vec(DIM);                   p['attn_b'] = vec(DIM)
    p['ffn_alpha'] = jnp.float32(0.7)
    p['ffn_w'] = 1.0 + vec(DIM);                    p['ffn_b'] = vec(DIM)
    p['w1_w'] = xavier(DIM, INTER_DIM);             p['w1_b'] = vec(INTER_DIM)
    p['w2_w'] = xavier(INTER_DIM, DIM);             p['w2_b'] = vec(DIM)
    p['w3_w'] = xavier(DIM, INTER_DIM);             p['w3_b'] = vec(INTER_DIM)
    return p


def pack_params(p):
    """Host-side packing: lane-dense fused weights + one (17,128) vector slab."""
    # embed weight with the contraction dim padded 10 -> 16 (zero rows)
    w_embed = jnp.zeros((IN_PAD, DIM), jnp.float32).at[:INPUT_DIM, :].set(p['embed_w'])
    # fused [wq_a | wkv_a]
    w_a = jnp.concatenate([p['wq_a_w'], p['wkv_a_w']], axis=1)          # (DIM, 32)
    # q / k / v weights zero-padded over the fused LoRA axis (no in-kernel slices)
    w_q = jnp.zeros((A_DIM, QK_HEAD), jnp.float32).at[:Q_LORA, :].set(p['wq_b_w'])
    w_k = jnp.zeros((A_DIM, QK_HEAD), jnp.float32).at[Q_LORA:, :].set(
        p['wkv_b_w'][:, :QK_HEAD])
    w_v = jnp.zeros((A_DIM, V_HEAD), jnp.float32).at[Q_LORA:, :].set(
        p['wkv_b_w'][:, QK_HEAD:])
    w_o = p['wo_w']
    # fused [w1 | w3]  -> 128-lane-wide matmul output
    w_13 = jnp.concatenate([p['w1_w'], p['w3_w']], axis=1)              # (DIM, 128)
    w_2 = p['w2_w']
    weights = [w_embed, w_a, w_q, w_k, w_v, w_o, w_13, w_2]

    vecs = np.zeros((N_VEC_ROWS, VEC_W), np.float32)

    def put(r, v):
        v = np.asarray(v, np.float32)
        vecs[r, :v.shape[0]] = v

    put(R_EMBED_B, p['embed_b'])
    put(R_A_B, jnp.concatenate([p['wq_a_b'], p['wkv_a_b']]))
    put(R_AN_ALPHA, jnp.concatenate([jnp.full((Q_LORA,), p['qn_alpha']),
                                     jnp.full((KV_LORA,), p['kvn_alpha'])]))
    put(R_AN_W, jnp.concatenate([p['qn_w'], p['kvn_w']]))
    put(R_AN_B, jnp.concatenate([p['qn_b'], p['kvn_b']]))
    put(R_Q_B, p['wq_b_b'])
    put(R_K_B, p['wkv_b_b'][:QK_HEAD])
    put(R_V_B, p['wkv_b_b'][QK_HEAD:])
    put(R_WO_B, p['wo_b'])
    put(R_ATTN_ALPHA, jnp.full((DIM,), p['attn_alpha']))
    put(R_ATTN_W, p['attn_w'])
    put(R_ATTN_B, p['attn_b'])
    put(R_FFN_ALPHA, jnp.full((DIM,), p['ffn_alpha']))
    put(R_FFN_W, p['ffn_w'])
    put(R_FFN_B, p['ffn_b'])
    put(R_W13_B, jnp.concatenate([p['w1_b'], p['w3_b']]))
    put(R_W2_B, p['w2_b'])
    return weights, jnp.asarray(vecs)


if __name__ == "__main__":
    key = jax.random.PRNGKey(0)
    k_tok, k_par = jax.random.split(key)

    tokens = jax.random.normal(k_tok, (B, S, INPUT_DIM), jnp.float32)
    # causal additive mask (S, S) — broadcasts like mask.unsqueeze(1) in the spec
    causal = jnp.where(jnp.arange(S)[:, None] >= jnp.arange(S)[None, :],
                       0.0, -1e9).astype(jnp.float32)

    raw = make_raw_params(k_par)
    weights, vecs = pack_params(raw)

    # host-side layout plumbing (free): flatten (B,S)->B*S, zero-pad features
    # 10 -> 16, and build the block-diagonal causal mask for fused attention.
    tokens2d = jnp.zeros((BS, IN_PAD), jnp.float32).at[:, :INPUT_DIM].set(
        tokens.reshape(BS, INPUT_DIM))
    mask_full = jnp.full((BS, BS), -1e9, jnp.float32)
    for b in range(B):
        mask_full = mask_full.at[b * S:(b + 1) * S, b * S:(b + 1) * S].set(causal)

    out = transformer_forward(tokens2d, mask_full, weights, vecs)
    out = jax.block_until_ready(out)

    ref = transformer_ref(tokens, causal, raw)
    assert out.shape == (B, S, DIM)
    assert bool(jnp.all(jnp.isfinite(out)))
    max_err = float(jnp.max(jnp.abs(out - ref)))
    assert bool(jnp.allclose(out, ref, atol=3e-3, rtol=3e-3)), \
        f"mismatch vs reference: max abs err {max_err}"

    print("KERNEL_OK")
</pallas_src>

<mosaic_0001>
module attributes {stable_mosaic.version = 11 : i64} {
  func.func @transformer_kernel(%arg0: memref<16x16xf32, #tpu.memory_space<vmem>>, %arg1: memref<16x16xf32, #tpu.memory_space<vmem>>, %arg2: memref<16x32xf32, #tpu.memory_space<vmem>>, %arg3: memref<32x32xf32, #tpu.memory_space<vmem>>, %arg4: memref<32x16xf32, #tpu.memory_space<vmem>>, %arg5: memref<32x16xf32, #tpu.memory_space<vmem>>, %arg6: memref<32x32xf32, #tpu.memory_space<vmem>>, %arg7: memref<32x32xf32, #tpu.memory_space<vmem>>, %arg8: memref<32x128xf32, #tpu.memory_space<vmem>>, %arg9: memref<64x32xf32, #tpu.memory_space<vmem>>, %arg10: memref<17x128xf32, #tpu.memory_space<vmem>>, %arg11: memref<16x32xf32, #tpu.memory_space<vmem>>) attributes {dimension_semantics = [], scalar_prefetch = 0 : i64, scratch_operands = 0 : i64, tpu.core_type = #tpu.core_type<tc>} {
    %c0 = arith.constant 0 : index
    %c0_0 = arith.constant 0 : index
    %0 = vector.load %arg0[%c0, %c0_0] : memref<16x16xf32, #tpu.memory_space<vmem>>, vector<16x16xf32>
    %c0_1 = arith.constant 0 : index
    %c0_2 = arith.constant 0 : index
    %1 = vector.load %arg1[%c0_1, %c0_2] : memref<16x16xf32, #tpu.memory_space<vmem>>, vector<16x16xf32>
    %c0_3 = arith.constant 0 : index
    %c0_4 = arith.constant 0 : index
    %2 = vector.load %arg2[%c0_3, %c0_4] : memref<16x32xf32, #tpu.memory_space<vmem>>, vector<16x32xf32>
    %cst = arith.constant dense<0.000000e+00> : vector<16x32xf32>
    %3 = tpu.matmul %0, %2, %cst {dimension_numbers = #tpu.dot_dimension_numbers<[1], [0], [0], [1], [0, 0, 1, 1], [], []>} : vector<16x16xf32>, vector<16x32xf32>, vector<16x32xf32> -> vector<16x32xf32>
    %c0_5 = arith.constant 0 : index
    %c0_6 = arith.constant 0 : index
    %4 = vector.load %arg10[%c0_5, %c0_6] : memref<17x128xf32, #tpu.memory_space<vmem>>, vector<1x32xf32>
    %5 = vector.broadcast %4 : vector<1x32xf32> to vector<16x32xf32>
    %6 = arith.addf %3, %5 : vector<16x32xf32>
    %c9 = arith.constant 9 : index
    %c0_7 = arith.constant 0 : index
    %7 = vector.load %arg10[%c9, %c0_7] : memref<17x128xf32, #tpu.memory_space<vmem>>, vector<1x32xf32>
    %8 = vector.broadcast %7 : vector<1x32xf32> to vector<16x32xf32>
    %9 = arith.mulf %8, %6 : vector<16x32xf32>
    %10 = math.tanh %9 : vector<16x32xf32>
    %c10 = arith.constant 10 : index
    %c0_8 = arith.constant 0 : index
    %11 = vector.load %arg10[%c10, %c0_8] : memref<17x128xf32, #tpu.memory_space<vmem>>, vector<1x32xf32>
    %12 = vector.broadcast %11 : vector<1x32xf32> to vector<16x32xf32>
    %13 = arith.mulf %10, %12 : vector<16x32xf32>
    %c11 = arith.constant 11 : index
    %c0_9 = arith.constant 0 : index
    %14 = vector.load %arg10[%c11, %c0_9] : memref<17x128xf32, #tpu.memory_space<vmem>>, vector<1x32xf32>
    %15 = vector.broadcast %14 : vector<1x32xf32> to vector<16x32xf32>
    %16 = arith.addf %13, %15 : vector<16x32xf32>
    %c0_10 = arith.constant 0 : index
    %c0_11 = arith.constant 0 : index
    %17 = vector.load %arg3[%c0_10, %c0_11] : memref<32x32xf32, #tpu.memory_space<vmem>>, vector<32x32xf32>
    %cst_12 = arith.constant dense<0.000000e+00> : vector<16x32xf32>
    %18 = tpu.matmul %16, %17, %cst_12 {dimension_numbers = #tpu.dot_dimension_numbers<[1], [0], [0], [1], [0, 0, 1, 1], [], []>} : vector<16x32xf32>, vector<32x32xf32>, vector<16x32xf32> -> vector<16x32xf32>
    %c1 = arith.constant 1 : index
    %c0_13 = arith.constant 0 : index
    %19 = vector.load %arg10[%c1, %c0_13] : memref<17x128xf32, #tpu.memory_space<vmem>>, vector<1x32xf32>
    %20 = vector.broadcast %19 : vector<1x32xf32> to vector<16x32xf32>
    %21 = arith.addf %18, %20 : vector<16x32xf32>
    %c2 = arith.constant 2 : index
    %c0_14 = arith.constant 0 : index
    %22 = vector.load %arg10[%c2, %c0_14] : memref<17x128xf32, #tpu.memory_space<vmem>>, vector<1x32xf32>
    %23 = vector.broadcast %22 : vector<1x32xf32> to vector<16x32xf32>
    %24 = arith.mulf %23, %21 : vector<16x32xf32>
    %25 = math.tanh %24 : vector<16x32xf32>
    %c3 = arith.constant 3 : index
    %c0_15 = arith.constant 0 : index
    %26 = vector.load %arg10[%c3, %c0_15] : memref<17x128xf32, #tpu.memory_space<vmem>>, vector<1x32xf32>
    %27 = vector.broadcast %26 : vector<1x32xf32> to vector<16x32xf32>
    %28 = arith.mulf %25, %27 : vector<16x32xf32>
    %c4 = arith.constant 4 : index
    %c0_16 = arith.constant 0 : index
    %29 = vector.load %arg10[%c4, %c0_16] : memref<17x128xf32, #tpu.memory_space<vmem>>, vector<1x32xf32>
    %30 = vector.broadcast %29 : vector<1x32xf32> to vector<16x32xf32>
    %31 = arith.addf %28, %30 : vector<16x32xf32>
    %c0_17 = arith.constant 0 : index
    %c0_18 = arith.constant 0 : index
    %32 = vector.load %arg4[%c0_17, %c0_18] : memref<32x16xf32, #tpu.memory_space<vmem>>, vector<32x16xf32>
    %cst_19 = arith.constant dense<0.000000e+00> : vector<16x16xf32>
    %33 = tpu.matmul %31, %32, %cst_19 {dimension_numbers = #tpu.dot_dimension_numbers<[1], [0], [0], [1], [0, 0, 1, 1], [], []>} : vector<16x32xf32>, vector<32x16xf32>, vector<16x16xf32> -> vector<16x16xf32>
    %c5 = arith.constant 5 : index
    %c0_20 = arith.constant 0 : index
    %34 = vector.load %arg10[%c5, %c0_20] : memref<17x128xf32, #tpu.memory_space<vmem>>, vector<1x16xf32>
    %35 = vector.broadcast %34 : vector<1x16xf32> to vector<16x16xf32>
    %36 = arith.addf %33, %35 : vector<16x16xf32>
    %c0_21 = arith.constant 0 : index
    %c0_22 = arith.constant 0 : index
    %37 = vector.load %arg5[%c0_21, %c0_22] : memref<32x16xf32, #tpu.memory_space<vmem>>, vector<32x16xf32>
    %cst_23 = arith.constant dense<0.000000e+00> : vector<16x16xf32>
    %38 = tpu.matmul %31, %37, %cst_23 {dimension_numbers = #tpu.dot_dimension_numbers<[1], [0], [0], [1], [0, 0, 1, 1], [], []>} : vector<16x32xf32>, vector<32x16xf32>, vector<16x16xf32> -> vector<16x16xf32>
    %c6 = arith.constant 6 : index
    %c0_24 = arith.constant 0 : index
    %39 = vector.load %arg10[%c6, %c0_24] : memref<17x128xf32, #tpu.memory_space<vmem>>, vector<1x16xf32>
    %40 = vector.broadcast %39 : vector<1x16xf32> to vector<16x16xf32>
    %41 = arith.addf %38, %40 : vector<16x16xf32>
    %c0_25 = arith.constant 0 : index
    %c0_26 = arith.constant 0 : index
    %42 = vector.load %arg6[%c0_25, %c0_26] : memref<32x32xf32, #tpu.memory_space<vmem>>, vector<32x32xf32>
    %cst_27 = arith.constant dense<0.000000e+00> : vector<16x32xf32>
    %43 = tpu.matmul %31, %42, %cst_27 {dimension_numbers = #tpu.dot_dimension_numbers<[1], [0], [0], [1], [0, 0, 1, 1], [], []>} : vector<16x32xf32>, vector<32x32xf32>, vector<16x32xf32> -> vector<16x32xf32>
    %c7 = arith.constant 7 : index
    %c0_28 = arith.constant 0 : index
    %44 = vector.load %arg10[%c7, %c0_28] : memref<17x128xf32, #tpu.memory_space<vmem>>, vector<1x32xf32>
    %45 = vector.broadcast %44 : vector<1x32xf32> to vector<16x32xf32>
    %46 = arith.addf %43, %45 : vector<16x32xf32>
    %cst_29 = arith.constant dense<0.000000e+00> : vector<16x16xf32>
    %47 = tpu.matmul %36, %41, %cst_29 {dimension_numbers = #tpu.dot_dimension_numbers<[1], [1], [0], [0], [0, 0, 1, 0], [], []>} : vector<16x16xf32>, vector<16x16xf32>, vector<16x16xf32> -> vector<16x16xf32>
    %cst_30 = arith.constant 2.500000e-01 : f32
    %48 = vector.broadcast %cst_30 : f32 to vector<16x16xf32>
    %49 = arith.mulf %47, %48 : vector<16x16xf32>
    %50 = arith.addf %49, %1 : vector<16x16xf32>
    %cst_31 = arith.constant dense<0xFF800000> : vector<16xf32>
    %51 = vector.multi_reduction <maximumf>, %50, %cst_31 [1] : vector<16x16xf32> to vector<16xf32>
    %52 = vector.shape_cast %51 : vector<16xf32> to vector<16x1xf32>
    %53 = vector.broadcast %52 : vector<16x1xf32> to vector<16x16xf32>
    %54 = arith.subf %50, %53 : vector<16x16xf32>
    %55 = math.exp %54 : vector<16x16xf32>
    %cst_32 = arith.constant dense<0.000000e+00> : vector<16xf32>
    %56 = vector.multi_reduction <add>, %55, %cst_32 [1] : vector<16x16xf32> to vector<16xf32>
    %57 = vector.shape_cast %56 : vector<16xf32> to vector<16x1xf32>
    %58 = tpu.reciprocal %57 {approx = true} : vector<16x1xf32> -> vector<16x1xf32>
    %59 = vector.broadcast %58 : vector<16x1xf32> to vector<16x16xf32>
    %60 = arith.mulf %55, %59 : vector<16x16xf32>
    %cst_33 = arith.constant dense<0.000000e+00> : vector<16x32xf32>
    %61 = tpu.matmul %60, %46, %cst_33 {dimension_numbers = #tpu.dot_dimension_numbers<[1], [0], [0], [1], [0, 0, 1, 1], [], []>} : vector<16x16xf32>, vector<16x32xf32>, vector<16x32xf32> -> vector<16x32xf32>
    %c0_34 = arith.constant 0 : index
    %c0_35 = arith.constant 0 : index
    %62 = vector.load %arg7[%c0_34, %c0_35] : memref<32x32xf32, #tpu.memory_space<vmem>>, vector<32x32xf32>
    %cst_36 = arith.constant dense<0.000000e+00> : vector<16x32xf32>
    %63 = tpu.matmul %61, %62, %cst_36 {dimension_numbers = #tpu.dot_dimension_numbers<[1], [0], [0], [1], [0, 0, 1, 1], [], []>} : vector<16x32xf32>, vector<32x32xf32>, vector<16x32xf32> -> vector<16x32xf32>
    %c8 = arith.constant 8 : index
    %c0_37 = arith.constant 0 : index
    %64 = vector.load %arg10[%c8, %c0_37] : memref<17x128xf32, #tpu.memory_space<vmem>>, vector<1x32xf32>
    %65 = vector.broadcast %64 : vector<1x32xf32> to vector<16x32xf32>
    %66 = arith.addf %63, %65 : vector<16x32xf32>
    %67 = arith.addf %6, %66 : vector<16x32xf32>
    %c12 = arith.constant 12 : index
    %c0_38 = arith.constant 0 : index
    %68 = vector.load %arg10[%c12, %c0_38] : memref<17x128xf32, #tpu.memory_space<vmem>>, vector<1x32xf32>
    %69 = vector.broadcast %68 : vector<1x32xf32> to vector<16x32xf32>
    %70 = arith.mulf %69, %67 : vector<16x32xf32>
    %71 = math.tanh %70 : vector<16x32xf32>
    %c13 = arith.constant 13 : index
    %c0_39 = arith.constant 0 : index
    %72 = vector.load %arg10[%c13, %c0_39] : memref<17x128xf32, #tpu.memory_space<vmem>>, vector<1x32xf32>
    %73 = vector.broadcast %72 : vector<1x32xf32> to vector<16x32xf32>
    %74 = arith.mulf %71, %73 : vector<16x32xf32>
    %c14 = arith.constant 14 : index
    %c0_40 = arith.constant 0 : index
    %75 = vector.load %arg10[%c14, %c0_40] : memref<17x128xf32, #tpu.memory_space<vmem>>, vector<1x32xf32>
    %76 = vector.broadcast %75 : vector<1x32xf32> to vector<16x32xf32>
    %77 = arith.addf %74, %76 : vector<16x32xf32>
    %c0_41 = arith.constant 0 : index
    %c0_42 = arith.constant 0 : index
    %78 = vector.load %arg8[%c0_41, %c0_42] : memref<32x128xf32, #tpu.memory_space<vmem>>, vector<32x128xf32>
    %cst_43 = arith.constant dense<0.000000e+00> : vector<16x128xf32>
    %79 = tpu.matmul %77, %78, %cst_43 {dimension_numbers = #tpu.dot_dimension_numbers<[1], [0], [0], [1], [0, 0, 1, 1], [], []>} : vector<16x32xf32>, vector<32x128xf32>, vector<16x128xf32> -> vector<16x128xf32>
    %c15 = arith.constant 15 : index
    %c0_44 = arith.constant 0 : index
    %80 = vector.load %arg10[%c15, %c0_44] : memref<17x128xf32, #tpu.memory_space<vmem>>, vector<1x128xf32>
    %81 = vector.broadcast %80 : vector<1x128xf32> to vector<16x128xf32>
    %82 = arith.addf %79, %81 : vector<16x128xf32>
    %83 = vector.extract_strided_slice %82 {offsets = [0, 0], sizes = [16, 64], strides = [1, 1]} : vector<16x128xf32> to vector<16x64xf32>
    %84 = vector.extract_strided_slice %82 {offsets = [0, 64], sizes = [16, 64], strides = [1, 1]} : vector<16x128xf32> to vector<16x64xf32>
    %85 = arith.negf %83 : vector<16x64xf32>
    %86 = math.exp %85 : vector<16x64xf32>
    %cst_45 = arith.constant 1.000000e+00 : f32
    %87 = vector.broadcast %cst_45 : f32 to vector<16x64xf32>
    %88 = arith.addf %87, %86 : vector<16x64xf32>
    %89 = arith.divf %87, %88 : vector<16x64xf32>
    %90 = arith.mulf %83, %89 : vector<16x64xf32>
    %91 = arith.mulf %90, %84 : vector<16x64xf32>
    %c0_46 = arith.constant 0 : index
    %c0_47 = arith.constant 0 : index
    %92 = vector.load %arg9[%c0_46, %c0_47] : memref<64x32xf32, #tpu.memory_space<vmem>>, vector<64x32xf32>
    %cst_48 = arith.constant dense<0.000000e+00> : vector<16x32xf32>
    %93 = tpu.matmul %91, %92, %cst_48 {dimension_numbers = #tpu.dot_dimension_numbers<[1], [0], [0], [1], [0, 0, 1, 1], [], []>} : vector<16x64xf32>, vector<64x32xf32>, vector<16x32xf32> -> vector<16x32xf32>
    %c16 = arith.constant 16 : index
    %c0_49 = arith.constant 0 : index
    %94 = vector.load %arg10[%c16, %c0_49] : memref<17x128xf32, #tpu.memory_space<vmem>>, vector<1x32xf32>
    %95 = vector.broadcast %94 : vector<1x32xf32> to vector<16x32xf32>
    %96 = arith.addf %93, %95 : vector<16x32xf32>
    %97 = arith.addf %77, %96 : vector<16x32xf32>
    %c0_50 = arith.constant 0 : index
    %c0_51 = arith.constant 0 : index
    %98 = vector.load %arg11[%c0_50, %c0_51] : memref<16x32xf32, #tpu.memory_space<vmem>>, vector<16x32xf32>
    tpu.vector_store %arg11[%c0_50, %c0_51], %97 {strides = array<i32>} : memref<16x32xf32, #tpu.memory_space<vmem>>, vector<16x32xf32>,
    return
  }
}

</mosaic_0001>

<bundles_post_ra>
// kernel: tpu_custom_call.1
= control target key start
LH: loop header
LB: loop body
LE: loop exit
PB: predicated region body
PF: predicated region fallthrough
CT: control target
= control target key end

     0   :  { %16 = vsyncpa [#allocation3], 0  ;;  %s1712_s0 = inlined_call_operand.hbm [shape: f32[16,16], index: 0, kind: input, shape index: {}]   ;;  %s1713_s1 = inlined_call_operand.hbm [shape: f32[16,16], index: 1, kind: input, shape index: {}]   ;;  %s1714_s2 = inlined_call_operand.hbm [shape: f32[16,32], index: 2, kind: input, shape index: {}]   ;;  %s1715_s3 = inlined_call_operand.vmem [shape: f32[32,32], index: 3, kind: input, shape index: {}]   ;;  %s1716_s4 = inlined_call_operand.vmem [shape: f32[32,16], index: 4, kind: input, shape index: {}]   ;;  %s1717_s5 = inlined_call_operand.vmem [shape: f32[32,16], index: 5, kind: input, shape index: {}]   ;;  %s1718_s6 = inlined_call_operand.vmem [shape: f32[32,32], index: 6, kind: input, shape index: {}]   ;;  %s1719_s7 = inlined_call_operand.vmem [shape: f32[32,32], index: 7, kind: input, shape index: {}]   ;;  %s1720_s8 = inlined_call_operand.vmem [shape: f32[32,128], index: 8, kind: input, shape index: {}]   ;;  %s1721_s9 = inlined_call_operand.vmem [shape: f32[64,32], index: 9, kind: input, shape index: {}]   ;;  %s1722_s10 = inlined_call_operand.vmem [shape: f32[17,128], index: 10, kind: input, shape index: {}]   ;;  %s1723_s11 = inlined_call_operand.hbm [shape: f32[16,32], index: 11, kind: output, shape index: {}]  }
   0x1   :  { %17 = vsyncpa [#allocation6], 0 }
   0x2   :  { %18 = vsyncpa [#allocation4], 0  ;;  %s1434_s17 = smov [#allocation5]   ;;  %s1435_s19 = smov [#allocation2]  }
   0x3   :  { %s36_s18 = sshll.u32 %s1434_s17, 4  ;;  %s24_s20 = sshll.u32 %s1435_s19, 4  ;;  %s37_s18 = int_to_ptr.vmem [resolvable:$true] %s36_s18  ;;  %s25_s20 = int_to_ptr.vmem [resolvable:$true] %s24_s20 }
   0x4   :  { %s1356_s21 = scalar_lea.vmem %s37_s18, 256  ;;  %p1361_p1 = scmp.lt.s32.totalorder %s37_s18, %s37_s18 }
   0x5   :  { %p1357_p0 = scmp.ne.s32.totalorder %s37_s18, %s1356_s21  ;;  %p1362_p2 = scmp.lt.s32.totalorder %s1356_s21, %s1356_s21 }
   0x7   :  { %p1363_p3 = por %p1362_p2, %p1361_p1 }
   0x9   :  { %p1364_p4 = pnand %p1363_p3, %p1357_p0 }
   0xb   :  { %1367 = shalt.err (!%p1364_p4)
}
   0xc   :  { %s1436_s22 = smov 128   ;;  %s1437_s23 = smov 8  }
   0xd   :  { %42 = dma.hbm_to_vmem [thread:$0]  %s1713_s1, 256, %s37_s18, [#allocation6], %s1436_s22, %s1436_s22, %s1437_s23  }
   0xe   :  { %s1376_s26 = scalar_lea.vmem %s25_s20, 256  ;;  %p1381_p6 = scmp.lt.s32.totalorder %s25_s20, %s25_s20 }
   0xf   :  { %p1377_p5 = scmp.ne.s32.totalorder %s25_s20, %s1376_s26  ;;  %p1382_p7 = scmp.lt.s32.totalorder %s1376_s26, %s1376_s26 }
  0x11   :  { %p1383_p8 = por %p1382_p7, %p1381_p6 }
  0x13   :  { %p1384_p9 = pnand %p1383_p8, %p1377_p5 }
  0x15   :  { %1387 = shalt.err (!%p1384_p9)
}
  0x16   :  { %30 = dma.hbm_to_vmem [thread:$0]  %s1712_s0, 256, %s25_s20, [#allocation3], %s1436_s22, %s1436_s22, %s1437_s23  }
  0x17   :  { %s1438_s29 = smov [#allocation7]  }
  0x18   :  { %s48_s30 = sshll.u32 %s1438_s29, 4  ;;  %s49_s30 = int_to_ptr.vmem [resolvable:$true] %s48_s30 }
  0x19   :  { %s1396_s12 = scalar_lea.vmem %s49_s30, 256  ;;  %p1401_p11 = scmp.lt.s32.totalorder %s49_s30, %s49_s30 }
  0x1a   :  { %p1397_p10 = scmp.ne.s32.totalorder %s49_s30, %s1396_s12  ;;  %p1402_p12 = scmp.lt.s32.totalorder %s1396_s12, %s1396_s12 }
  0x1c   :  { %p1403_p13 = por %p1402_p12, %p1401_p11 }
  0x1e   :  { %p1404_p0 = pnand %p1403_p13, %p1397_p10 }
  0x20   :  { %1407 = shalt.err (!%p1404_p0)
}
  0x21   :  { %54 = dma.hbm_to_vmem [thread:$0]  %s1714_s2, 256, %s49_s30, [#allocation6], %s1436_s22, %s1436_s22, %s1437_s23  }
  0x22   :  { %1428 = dma.done.wait [#allocation3], 256  }
  0x23   :  { %1429 = vsyncadd [#allocation3], 4294967040 }
  0x24   :  { %1430 = dma.done.wait [#allocation6], 512  }
  0x25   :  { %1431 = vsyncadd [#allocation6], 4294966784  ;;  %vm91_vm0 = vcmask 130048   ;;  %v85_v0 = vld [vmem:[#allocation7 + $0x8] sm:$0xff]  ;;  %v84_v1 = vld [vmem:[#allocation7] sm:$0xff]  ;;  %vm205_vm1 = vcmask 261120  }
  0x26   :  { %v80_v2 = vld [vmem:[#allocation2] sm:$0xff]  ;;  %1207 = vmatprep.subr.mxu0 %v85_v0  ;;  %v81_v3 = vld [vmem:[#allocation2 + $0x8] sm:$0xff]  ;;  %v199_v4 = vld [vmem:[%s1715_s3 + $0x18] sm:$0xff]  ;;  %s1439_s14 = smov 64   ;;  %vm1004_vm2 = vcmask 523264   ;;  %s1440_s15 = smov [#allocation8]  }
  0x27   :  { %1211 = vmatprep.mubr.msk.f32.mxu0 %vm91_vm0, %v80_v2  ;;  %1208 = vmatpush3.msra.mxu0 %v85_v0  ;;  %v198_v5 = vld [vmem:[%s1715_s3 + $0x10] sm:$0xff]  ;;  %v197_v6 = vld [vmem:[%s1715_s3 + $0x8] sm:$0xff]  ;;  %v196_v7 = vld [vmem:[%s1715_s3] sm:$0xff]  ;;  %s1095_s16 = sshll.u32 %s1440_s15, 4  ;;  %s1096_s16 = int_to_ptr.vmem [resolvable:$true] %s1095_s16 }
  0x28   :  { %1209 = vmatprep.subr.mxu0 %v84_v1  ;;  %1214 = vmatprep.subr.mxu1 %v199_v4  ;;  %v1108_v8 = vld [vmem:[%s1722_s10] ss:$0 sm:$0xff]  ;;  %v1111_v10 = vld [vmem:[%s1722_s10 + $0x9] ss:$0 sm:$0xff]  ;;  %v1112_v16 = vld [vmem:[%s1722_s10 + $0xa] ss:$0 sm:$0xff]  ;;  %p1413_p2 = scmp.lt.s32.totalorder %s1096_s16, %s1096_s16 }
  0x29   :  { %1210 = vmatpush3.msra.mxu0 %v84_v1  ;;  %1215 = vmatpush3.msra.mxu1 %v199_v4  ;;  %v1113_v21 = vld [vmem:[%s1722_s10 + $0xb] ss:$0 sm:$0xff]  ;;  %v313_v24 = vld [vmem:[%s1716_s4 + $0x18] sm:$0xff]  ;;  %v312_v26 = vld [vmem:[%s1716_s4 + $0x10] sm:$0xff] }
  0x2a   :  { %1212 = vmatmul.mubr.msk.f32.vlgmr.msra.gmra.mxu0 %vm91_vm0, %v81_v3  ;;  %1216 = vmatprep.subr.mxu1 %v198_v5  ;;  %v487_v25 = vld [vmem:[%s1718_s6 + $0x18] sm:$0xff]  ;;  %v486_v27 = vld [vmem:[%s1718_s6 + $0x10] sm:$0xff]  ;;  %v311_v28 = vld [vmem:[%s1716_s4 + $0x8] sm:$0xff] }
  0x2b   :  { %1217 = vmatpush3.msra.mxu1 %v198_v5  ;;  %1247 = vmatprep.subr.mxu0 %v487_v25  ;;  %v485_v29 = vld [vmem:[%s1718_s6 + $0x8] sm:$0xff]  ;;  %v310_v30 = vld [vmem:[%s1716_s4] sm:$0xff]  ;;  %v403_v32 = vld [vmem:[%s1717_s5 + $0x18] sm:$0xff] }
  0x2c   :  { %1218 = vmatprep.subr.mxu1 %v197_v6  ;;  %1248 = vmatpush3.msra.mxu0 %v487_v25  ;;  %v484_v31 = vld [vmem:[%s1718_s6] sm:$0xff]  ;;  %v402_v49 = vld [vmem:[%s1717_s5 + $0x10] sm:$0xff]  ;;  %v401_v50 = vld [vmem:[%s1717_s5 + $0x8] sm:$0xff] }
  0x2d   :  { %1219 = vmatpush3.msra.mxu1 %v197_v6  ;;  %1249 = vmatprep.subr.mxu0 %v486_v27  ;;  %v1114_v33 = vld [vmem:[%s1722_s10 + $0x1] ss:$0 sm:$0xff]  ;;  %v1117_v35 = vld [vmem:[%s1722_s10 + $0x2] ss:$0 sm:$0xff]  ;;  %v1118_v41 = vld [vmem:[%s1722_s10 + $0x3] ss:$0 sm:$0xff] }
  0x2e   :  { %1220 = vmatprep.subr.mxu1 %v196_v7  ;;  %1250 = vmatpush3.msra.mxu0 %v486_v27  ;;  %v1119_v46 = vld [vmem:[%s1722_s10 + $0x4] ss:$0 sm:$0xff]  ;;  %v1126_v52 = vld [vmem:[%s1722_s10 + $0x7] ss:$0 sm:$0xff]  ;;  %v1120_v56 = vld [vmem:[%s1722_s10 + $0x5] ss:$0 sm:$0xff] }
  0x2f   :  { %1221 = vmatpush3.msra.mxu1 %v196_v7  ;;  %1251 = vmatprep.subr.mxu0 %v485_v29  ;;  %v400_v51 = vld [vmem:[%s1717_s5] sm:$0xff]  ;;  %v82_v5 = vld [vmem:[#allocation5] sm:$0xff]  ;;  %v765_v25 = vld [vmem:[%s1719_s7 + $0x18] sm:$0xff] }
  0x30   :  { %1225 = vmatprep.subr.mxu1 %v313_v24  ;;  %1252 = vmatpush3.msra.mxu0 %v485_v29  ;;  %v1123_v61 = vld [vmem:[%s1722_s10 + $0x6] ss:$0 sm:$0xff] }
  0x31   :  { %1253 = vmatprep.subr.mxu0 %v484_v31 }
  0x32   :  { %1254 = vmatpush3.msra.mxu0 %v484_v31 }
  0xea   :  { %v1213_v9 = vpop.f32.mrf.mxu0 }
  0xeb   :  { %v1539_v11 = vadd.f32 %v1213_v9, %v1108_v8 }
  0xec   :  { %v164_v12 = vpop.f32.mrf.mxu0 }
  0xed   :  { %v179_v13 = vmul.f32 %v1111_v10, %v1539_v11  ;;  %v1542_v14 = vadd.f32 %v1108_v8, %v164_v12  ;;  %v83_v8 = vld [vmem:[#allocation5 + $0x8] sm:$0xff] }
  0xef   :  { %1320 = vtanh.f32 %v179_v13  ;;  %v178_v15 = vmul.f32 %v1111_v10, %v1542_v14 }
  0xf1   :  { %1322 = vtanh.f32 %v178_v15 }
  0xfc   :  { %v1321_v17 = vpop.eup %1320 }
  0xfd   :  { %v188_v19 = vmul.f32 %v1321_v17, %v1112_v16 }
  0xfe   :  { %v1323_v18 = vpop.eup %1322 }
  0xff   :  { %v187_v20 = vmul.f32 %v1323_v18, %v1112_v16  ;;  %v195_v23 = vadd.f32 %v1113_v21, %v188_v19 }
 0x101   :  { %v194_v22 = vadd.f32 %v1113_v21, %v187_v20 }
 0x103   :  { %1222 = vmatprep.mubr.msk.f32.mxu1 %vm205_vm1, %v194_v22 }
 0x104   :  { %1223 = vmatmul.mubr.msk.f32.vlgmr.msra.gmra.mxu1 %vm205_vm1, %v195_v23 }
 0x105   :  { %1226 = vmatpush3.msra.mxu1 %v313_v24 }
 0x106   :  { %1227 = vmatprep.subr.mxu1 %v312_v26 }
 0x107   :  { %1228 = vmatpush3.msra.mxu1 %v312_v26 }
 0x108   :  { %1229 = vmatprep.subr.mxu1 %v311_v28 }
 0x109   :  { %1230 = vmatpush3.msra.mxu1 %v311_v28 }
 0x10a   :  { %1231 = vmatprep.subr.mxu1 %v310_v30 }
 0x10b   :  { %1232 = vmatpush3.msra.mxu1 %v310_v30 }
 0x10c   :  { %1236 = vmatprep.subr.mxu1 %v403_v32 }
 0x1c4   :  { %v1224_v34 = vpop.f32.mrf.mxu1 }
 0x1c5   :  { %v284_v36 = vadd.f32 %v1224_v34, %v1114_v33  ;;  %v762_v34 = vld [vmem:[%s1719_s7] sm:$0xff] }
 0x1c6   :  { %v278_v37 = vpop.f32.mrf.mxu1 }
 0x1c7   :  { %v293_v38 = vmul.f32 %v1117_v35, %v284_v36  ;;  %v279_v39 = vadd.f32 %v1114_v33, %v278_v37  ;;  %v763_v33 = vld [vmem:[%s1719_s7 + $0x8] sm:$0xff]  ;;  %v880_v37 = vld [vmem:[%s1720_s8 + $0x18] sm:$0xff] }
 0x1c9   :  { %1324 = vtanh.f32 %v293_v38  ;;  %v292_v40 = vmul.f32 %v1117_v35, %v279_v39  ;;  %v879_v38 = vld [vmem:[%s1720_s8 + $0x10] sm:$0xff]  ;;  %v878_v39 = vld [vmem:[%s1720_s8 + $0x8] sm:$0xff] }
 0x1cb   :  { %1326 = vtanh.f32 %v292_v40  ;;  %v877_v40 = vld [vmem:[%s1720_s8] sm:$0xff]  ;;  %s1408_s8 = scalar_lea.vmem %s1096_s16, 256 }
 0x1cc   :  { %p1409_p1 = scmp.ne.s32.totalorder %s1096_s16, %s1408_s8  ;;  %p1414_p3 = scmp.lt.s32.totalorder %s1408_s8, %s1408_s8 }
 0x1ce   :  { %p1415_p4 = por %p1414_p3, %p1413_p2 }
 0x1d0   :  { %p1416_p5 = pnand %p1415_p4, %p1409_p1 }
 0x1d6   :  { %v1325_v42 = vpop.eup %1324 }
 0x1d7   :  { %v302_v44 = vmul.f32 %v1325_v42, %v1118_v41 }
 0x1d8   :  { %v1327_v43 = vpop.eup %1326 }
 0x1d9   :  { %v301_v45 = vmul.f32 %v1327_v43, %v1118_v41  ;;  %v309_v48 = vadd.f32 %v1119_v46, %v302_v44  ;;  %v1135_v41 = vld [vmem:[%s1722_s10 + $0x8] ss:$0 sm:$0xff]  ;;  %v1138_v44 = vld [vmem:[%s1722_s10 + $0xc] ss:$0 sm:$0xff] }
 0x1db   :  { %v308_v47 = vadd.f32 %v1119_v46, %v301_v45 }
 0x1dd   :  { %1233 = vmatprep.mubr.msk.f32.mxu1 %vm205_vm1, %v308_v47  ;;  %1255 = vmatprep.mubr.msk.f32.mxu0 %vm205_vm1, %v308_v47 }
 0x1de   :  { %1234 = vmatmul.mubr.msk.f32.vlgmr.msra.gmra.mxu1 %vm205_vm1, %v309_v48  ;;  %1256 = vmatmul.mubr.msk.f32.vlgmr.msra.gmra.mxu0 %vm205_vm1, %v309_v48 }
 0x1df   :  { %1237 = vmatpush3.msra.mxu1 %v403_v32  ;;  %1244 = vmatprep.mubr.msk.f32.mxu1 %vm205_vm1, %v308_v47  ;;  %v764_v32 = vld [vmem:[%s1719_s7 + $0x10] sm:$0xff] }
 0x1e0   :  { %1238 = vmatprep.subr.mxu1 %v402_v49 }
 0x1e1   :  { %1239 = vmatpush3.msra.mxu1 %v402_v49 }
 0x1e2   :  { %1240 = vmatprep.subr.mxu1 %v401_v50 }
 0x1e3   :  { %1241 = vmatpush3.msra.mxu1 %v401_v50 }
 0x1e4   :  { %1242 = vmatprep.subr.mxu1 %v400_v51 }
 0x1e5   :  { %1243 = vmatpush3.msra.mxu1 %v400_v51  ;;  %v1139_v51 = vld [vmem:[%s1722_s10 + $0xd] ss:$0 sm:$0xff] }
 0x1e6   :  { %1245 = vmatmul.mubr.msk.f32.vlgmr.msra.gmra.mxu1 %vm205_vm1, %v309_v48 }
 0x29e   :  { %v1235_v53 = vpop.f32.mrf.mxu1  ;;  %v1257_v54 = vpop.f32.mrf.mxu0 }
 0x29f   :  { %v565_v55 = vadd.f32 %v1257_v54, %v1126_v52  ;;  %v397_v2 = vadd.f32 %v1235_v53, %v1120_v56 }
 0x2a0   :  { %v391_v57 = vpop.f32.mrf.mxu1  ;;  %v559_v58 = vpop.f32.mrf.mxu0 }
 0x2a1   :  { %v392_v59 = vadd.f32 %v1120_v56, %v391_v57  ;;  %v560_v60 = vadd.f32 %v1126_v52, %v559_v58  ;;  %1265 = vmatprep.subr.mxu0 %v565_v55  ;;  %v1140_v56 = vld [vmem:[%s1722_s10 + $0xe] ss:$0 sm:$0xff]  ;;  %v997_v58 = vld [vmem:[%s1721_s9 + $0x30] sm:$0xff] }
 0x2a2   :  { %1266 = vmatpush3.msra.mxu0 %v565_v55 }
 0x2a3   :  { %1262 = vmatprep.mubr.msk.f32.mxu1 %vm91_vm0, %v392_v59  ;;  %1267 = vmatprep.subr.mxu0 %v560_v60  ;;  %v996_v59 = vld [vmem:[%s1721_s9 + $0x28] sm:$0xff] }
 0x2a4   :  { %1268 = vmatpush3.msra.mxu0 %v560_v60  ;;  %v995_v60 = vld [vmem:[%s1721_s9 + $0x20] sm:$0xff] }
 0x2a5   :  { %1272 = vmatprep.subr.mxu0 %v765_v25 }
 0x2a6   :  { %v1246_v62 = vpop.f32.mrf.mxu1 }
 0x2a7   :  { %v481_v63 = vadd.f32 %v1246_v62, %v1123_v61  ;;  %v993_v62 = vld [vmem:[%s1721_s9 + $0x10] sm:$0xff] }
 0x2a8   :  { %v475_v0 = vpop.f32.mrf.mxu1 }
 0x2a9   :  { %v476_v1 = vadd.f32 %v1123_v61, %v475_v0  ;;  %1258 = vmatprep.subr.msk.mxu1 %vm91_vm0, %v481_v63  ;;  %v994_v61 = vld [vmem:[%s1721_s9 + $0x18] sm:$0xff]  ;;  %v991_v0 = vld [vmem:[%s1721_s9] sm:$0xff] }
 0x2aa   :  { %1259 = vmatpush3.xpose.msk.msra.mxu1 %vm91_vm0, %v481_v63  ;;  %v992_v63 = vld [vmem:[%s1721_s9 + $0x8] sm:$0xff] }
 0x2ab   :  { %1260 = vmatprep.subr.msk.mxu1 %vm91_vm0, %v476_v1 }
 0x2ae   :  { %1261 = vmatpush3.xpose.msk.msra.mxu1 %vm91_vm0, %v476_v1  ;;  %v1141_v1 = vld [vmem:[%s1722_s10 + $0xf] ss:$0 sm:$0xff] }
 0x2af   :  { %1283 = vmatprep.subr.mxu1 %v880_v37 }
 0x2b1   :  { %1263 = vmatmul.mubr.msk.f32.vlgmr.msra.gmra.mxu1 %vm91_vm0, %v397_v2 }
 0x2b2   :  { %1284 = vmatpush3.msra.mxu1 %v880_v37 }
 0x2b3   :  { %1285 = vmatprep.subr.mxu1 %v879_v38 }
 0x2b4   :  { %1286 = vmatpush3.msra.mxu1 %v879_v38 }
 0x2b5   :  { %1287 = vmatprep.subr.mxu1 %v878_v39 }
 0x2b6   :  { %1288 = vmatpush3.msra.mxu1 %v878_v39 }
 0x2b7   :  { %1289 = vmatprep.subr.mxu1 %v877_v40 }
 0x2b8   :  { %1290 = vmatpush3.msra.mxu1 %v877_v40 }
 0x371   :  { %v1264_v3 = vpop.f32.mrf.mxu1 }
 0x372   :  { %v656_v6 = vmul.f32 0.25, %v1264_v3 }
 0x373   :  { %v646_v4 = vpop.f32.mrf.mxu1 }
 0x374   :  { %v655_v7 = vmul.f32 0.25, %v646_v4  ;;  %v658_v12 = vadd.f32 %v656_v6, %v83_v8 }
 0x376   :  { %v657_v9 = vadd.f32 %v655_v7, %v82_v5  ;;  %v662_v13 = vsel %vm91_vm0, %v658_v12, -inf }
 0x378   :  { %v659_v10 = vsel %vm91_vm0, %v657_v9, -inf }
 0x379   :  { %660 = vmax.xlane.f32.xlu0 %v659_v10 }
 0x37d   :  { %663 = vmax.xlane.f32.xlu0 %v662_v13 }
 0x402   :  { %v661_v15 = vpop.xlane.xlu0 %660 }
 0x403   :  { %v665_v16 = vsub.f32 %v657_v9, %v661_v15 }
 0x405   :  { %v667_v17 = vmul.f32 1.442695, %v665_v16 }
 0x406   :  { %v664_v18 = vpop.xlane.xlu0 %663 }
 0x407   :  { %1328 = vpow2.f32 %v667_v17  ;;  %v666_v19 = vsub.f32 %v658_v12, %v664_v18 }
 0x409   :  { %v669_v20 = vmul.f32 1.442695, %v666_v19 }
 0x40b   :  { %1330 = vpow2.f32 %v669_v20 }
 0x414   :  { %v1329_v21 = vpop.eup %1328 }
 0x415   :  { %v671_v22 = vsel %vm91_vm0, %v1329_v21, 0.0 }
 0x416   :  { %672 = vadd.xlane.f32.xlu1 %v671_v22  ;;  %v1146_v22 = vld [vmem:[%s1722_s10 + $0x10] ss:$0 sm:$0xff] }
 0x418   :  { %v1331_v23 = vpop.eup %1330 }
 0x419   :  { %v674_v24 = vsel %vm91_vm0, %v1331_v23, 0.0 }
 0x41a   :  { %675 = vadd.xlane.f32.xlu1 %v674_v24 }
 0x49f   :  { %v673_v26 = vpop.xlane.xlu1 %672 }
 0x4a0   :  { %1332 = vrcp.f32 %v673_v26 }
 0x4a3   :  { %v676_v27 = vpop.xlane.xlu1 %675 }
 0x4a4   :  { %1334 = vrcp.f32 %v676_v27 }
 0x4ad   :  { %v1333_v28 = vpop.eup %1332 }
 0x4ae   :  { %v679_v29 = vmul.f32 %v1333_v28, %v1329_v21 }
 0x4b0   :  { %1269 = vmatprep.mubr.msk.f32.mxu0 %vm91_vm0, %v679_v29 }
 0x4b1   :  { %v1335_v30 = vpop.eup %1334 }
 0x4b2   :  { %v680_v31 = vmul.f32 %v1335_v30, %v1331_v23 }
 0x4b4   :  { %1270 = vmatmul.mubr.msk.f32.vlgmr.msra.gmra.mxu0 %vm91_vm0, %v680_v31 }
 0x4b5   :  { %1273 = vmatpush3.msra.mxu0 %v765_v25 }
 0x4b6   :  { %1274 = vmatprep.subr.mxu0 %v764_v32 }
 0x4b7   :  { %1275 = vmatpush3.msra.mxu0 %v764_v32 }
 0x4b8   :  { %1276 = vmatprep.subr.mxu0 %v763_v33 }
 0x4b9   :  { %1277 = vmatpush3.msra.mxu0 %v763_v33 }
 0x4ba   :  { %1278 = vmatprep.subr.mxu0 %v762_v34 }
 0x4bb   :  { %1279 = vmatpush3.msra.mxu0 %v762_v34 }
 0x574   :  { %v1271_v35 = vpop.f32.mrf.mxu0 }
 0x576   :  { %v753_v36 = vpop.f32.mrf.mxu0 }
 0x577   :  { %1280 = vmatprep.mubr.msk.f32.mxu0 %vm205_vm1, %v753_v36 }
 0x578   :  { %1281 = vmatmul.mubr.msk.f32.vlgmr.msra.gmra.mxu0 %vm205_vm1, %v1271_v35 }
 0x638   :  { %v1282_v42 = vpop.f32.mrf.mxu0 }
 0x639   :  { %v849_v43 = vadd.f32 %v1282_v42, %v1135_v41 }
 0x63a   :  { %v843_v45 = vpop.f32.mrf.mxu0 }
 0x63b   :  { %v853_v46 = vadd.f32 %v849_v43, %v1539_v11  ;;  %v844_v47 = vadd.f32 %v1135_v41, %v843_v45 }
 0x63d   :  { %v860_v48 = vmul.f32 %v1138_v44, %v853_v46  ;;  %v852_v49 = vadd.f32 %v844_v47, %v1542_v14  ;;  %v998_v14 = vld [vmem:[%s1721_s9 + $0x38] sm:$0xff] }
 0x63e   :  { %1294 = vmatprep.subr.mxu0 %v998_v14 }
 0x63f   :  { %1336 = vtanh.f32 %v860_v48  ;;  %v859_v50 = vmul.f32 %v1138_v44, %v852_v49  ;;  %1295 = vmatpush3.msra.mxu0 %v998_v14 }
 0x640   :  { %1296 = vmatprep.subr.mxu0 %v997_v58 }
 0x641   :  { %1338 = vtanh.f32 %v859_v50  ;;  %1297 = vmatpush3.msra.mxu0 %v997_v58 }
 0x642   :  { %1298 = vmatprep.subr.mxu0 %v996_v59 }
 0x643   :  { %1299 = vmatpush3.msra.mxu0 %v996_v59 }
 0x644   :  { %1300 = vmatprep.subr.mxu0 %v995_v60 }
 0x645   :  { %1301 = vmatpush3.msra.mxu0 %v995_v60 }
 0x646   :  { %1302 = vmatprep.subr.mxu0 %v994_v61 }
 0x647   :  { %1303 = vmatpush3.msra.mxu0 %v994_v61 }
 0x648   :  { %1304 = vmatprep.subr.mxu0 %v993_v62 }
 0x649   :  { %1305 = vmatpush3.msra.mxu0 %v993_v62 }
 0x64a   :  { %1306 = vmatprep.subr.mxu0 %v992_v63 }
 0x64b   :  { %1307 = vmatpush3.msra.mxu0 %v992_v63 }
 0x64c   :  { %v1337_v52 = vpop.eup %1336  ;;  %1308 = vmatprep.subr.mxu0 %v991_v0 }
 0x64d   :  { %v869_v54 = vmul.f32 %v1337_v52, %v1139_v51  ;;  %1309 = vmatpush3.msra.mxu0 %v991_v0 }
 0x64e   :  { %v1339_v53 = vpop.eup %1338 }
 0x64f   :  { %v868_v55 = vmul.f32 %v1339_v53, %v1139_v51  ;;  %v876_v57 = vadd.f32 %v1140_v56, %v869_v54 }
 0x651   :  { %v1668_v11 = vadd.f32 %v1140_v56, %v868_v55 }
 0x653   :  { %1291 = vmatprep.mubr.msk.f32.mxu1 %vm205_vm1, %v1668_v11 }
 0x654   :  { %1292 = vmatmul.mubr.msk.f32.vlgmr.msra.gmra.mxu1 %vm205_vm1, %v876_v57 }
 0x714   :  { %v1293_v2 = vpop.f32.mrf.mxu1 }
 0x715   :  { %v964_v3 = vadd.f32 %v1293_v2, %v1141_v1 }
 0x716   :  { %v958_v4 = vpop.f32.mrf.mxu1 }
 0x717   :  { %v959_v5 = vadd.f32 %v1141_v1, %v958_v4  ;;  %985 = vrot.lane.b32.xlu1 %v964_v3, %s1439_s14  ;;  %v1145_v7 = vmul.f32 -1.442695, %v964_v3 }
 0x719   :  { %983 = vrot.lane.b32.xlu0 %v959_v5, %s1439_s14  ;;  %v1144_v6 = vmul.f32 -1.442695, %v959_v5 }
 0x71b   :  { %1340 = vpow2.f32 %v1144_v6 }
 0x71c   :  { %1342 = vpow2.f32 %v1145_v7 }
 0x728   :  { %v1341_v8 = vpop.eup %1340 }
 0x729   :  { %v1343_v9 = vpop.eup %1342  ;;  %v973_v10 = vadd.f32 1.0, %v1341_v8 }
 0x72a   :  { %v974_v12 = vadd.f32 1.0, %v1343_v9 }
 0x72b   :  { %1344 = vrcp.f32 %v973_v10 }
 0x72c   :  { %1346 = vrcp.f32 %v974_v12 }
 0x738   :  { %v1345_v13 = vpop.eup %1344 }
 0x739   :  { %v1347_v15 = vpop.eup %1346  ;;  %v979_v17 = vmul.f32 %v1345_v13, %v959_v5 }
 0x73a   :  { %v980_v18 = vmul.f32 %v1347_v15, %v964_v3 }
 0x789   :  { %v986_v16 = vpop.permute.xlu1 %985 }
 0x78a   :  { %v990_v21 = vmul.f32 %v986_v16, %v980_v18 }
 0x78b   :  { %v984_v19 = vpop.permute.xlu0 %983 }
 0x78c   :  { %v989_v20 = vmul.f32 %v984_v19, %v979_v17 }
 0x78e   :  { %1310 = vmatprep.mubr.msk.f32.mxu0 %vm1004_vm2, %v989_v20 }
 0x78f   :  { %1311 = vmatmul.mubr.msk.f32.vlgmr.msra.gmra.mxu0 %vm1004_vm2, %v990_v21 }
 0x84f   :  { %v1312_v23 = vpop.f32.mrf.mxu0 }
 0x850   :  { %v1083_v24 = vadd.f32 %v1312_v23, %v1146_v22 }
 0x851   :  { %v1077_v25 = vpop.f32.mrf.mxu0 }
 0x852   :  { %v1087_v26 = vadd.f32 %v1083_v24, %v876_v57  ;;  %v1078_v27 = vadd.f32 %v1146_v22, %v1077_v25 }
 0x854   :  { %1089 = vst.msk [vmem:[#allocation8 + $0x8] sm:$0xff] %vm205_vm1, %v1087_v26  ;;  %v1086_v28 = vadd.f32 %v1078_v27, %v1668_v11 }
 0x856   :  { %1088 = vst.msk [vmem:[#allocation8] sm:$0xff] %vm205_vm1, %v1086_v28 }
 0x857   :  { %1419 = shalt.err (!%p1416_p5)
}
 0x858   :  { %1101 = dma.vmem_to_hbm [thread:$0]  %s1096_s16, 256, %s1723_s11, [#allocation4], %s1436_s22, %s1436_s22, %s1437_s23  }
 0x859   :  { %1432 = dma.done.wait [#allocation4], 256  }
 0x85a   :  { %1433 = vsyncadd [#allocation4], 4294967040 }
 0x85b   :  { %1105 = vsyncpa [#allocation3], 1 }
 0x85c   :  { %1106 = vsyncpa [#allocation6], 1 }
 0x85d   :  { %1107 = vsyncpa [#allocation4], 1 }

</bundles_post_ra>
